<compile_context>
chip_gen: v6e
topology: v6e:2x2x1
jax: 0.10.0
libtpu: 0.0.40
codegen_flags: <defaults>
</compile_context>

<pallas_src>
import functools
import math

import jax
import jax.numpy as jnp
from jax.experimental import pallas as pl
from jax.experimental.pallas import tpu as pltpu

ALPHA = 0.2      # LeakyReLU negative slope
DROPOUT = 0.6    # unused at inference (training=False)
NEG_INF = -9.0e15


def gat_kernel(x_ref, bias_ref, p1_ref, p2_ref, out_ref, *,
               nheads, nhid, nclass, alpha):
    f32 = jnp.float32
    H, D, C = nheads, nhid, nclass
    HD = H * D

    x = x_ref[...]                                        # [N, F]
    bias = bias_ref[...]                                  # [N, N] additive mask

    # ---- hidden GAT layer ---------------------------------------------------
    # One wide MXU matmul: head projections + folded attention-vector
    # projections all come out of a single [N, F] @ [F, H*D + 2H] product.
    proj = jnp.dot(x, p1_ref[...], preferred_element_type=f32)     # [N, HD+2H]
    wh_flat = proj[:, :HD]                                # [N, H*D] = concat_h(x @ W_h)
    wh1 = proj[:, HD:HD + H].T                            # [H, N]   Wh_h @ a_h[:D]
    wh2 = proj[:, HD + H:HD + 2 * H].T                    # [H, N]   Wh_h @ a_h[D:]

    # e[h,i,j] = LeakyReLU(wh1[h,i] + wh2[h,j]); masked softmax over j.
    e = wh1[:, :, None] + wh2[:, None, :]                 # [H, N, N]
    e = jnp.maximum(e, alpha * e)                         # LeakyReLU, one VALU op
    logits = e + bias[None, :, :]                         # additive adjacency mask
    p = jnp.exp(logits - jnp.max(logits, axis=-1, keepdims=True))
    p = p * pl.reciprocal(jnp.sum(p, axis=-1, keepdims=True), approx=True)

    # h_prime written straight into the [N, H*D] head-concat layout: the
    # P_h @ Wh_h matmuls are inherently per-head (P is [N,N] per head), but the
    # lane-concatenated result feeds the output layer as a single K=H*D matmul.
    hp = jnp.concatenate(
        [jnp.dot(p[h], wh_flat[:, h * D:(h + 1) * D], preferred_element_type=f32)
         for h in range(H)],
        axis=1)                                           # [N, H*D]
    x1 = jnp.where(hp > 0.0, hp, jnp.exp(jnp.minimum(hp, 0.0)) - 1.0)   # ELU

    # ---- output GAT layer ---------------------------------------------------
    # Single K=H*D matmul against packed [W_out | W_out@a_o1 | W_out@a_o2].
    proj_o = jnp.dot(x1, p2_ref[...], preferred_element_type=f32)   # [N, C+2]
    who = proj_o[:, :C]                                   # [N, C]
    wo1 = proj_o[:, C:C + 1]                              # [N, 1]
    wo2 = proj_o[:, C + 1:C + 2].T                        # [1, N]

    e_o = wo1 + wo2                                       # [N, N]
    e_o = jnp.maximum(e_o, alpha * e_o)
    logits_o = e_o + bias
    p_o = jnp.exp(logits_o - jnp.max(logits_o, axis=-1, keepdims=True))
    p_o = p_o * pl.reciprocal(jnp.sum(p_o, axis=-1, keepdims=True), approx=True)
    hpo = jnp.dot(p_o, who, preferred_element_type=f32)   # [N, C]

    # GAT.forward: F.elu then log_softmax over classes.
    z = jnp.where(hpo > 0.0, hpo, jnp.exp(jnp.minimum(hpo, 0.0)) - 1.0)
    zs = z - jnp.max(z, axis=-1, keepdims=True)
    # Note: with C=8 this is a masked (non-lane-dense) store; padding the class
    # dim to 128 is possible but is noise at this size.
    out_ref[...] = zs - jnp.log(jnp.sum(jnp.exp(zs), axis=-1, keepdims=True))


def prepare_params(params):
    """One-time layout prep / weight folding (kept out of the per-call path)."""
    hi = jax.lax.Precision.HIGHEST
    Ws, a_hs, Wo, a_o = params            # [H,F,D], [H,2D], [H*D,C], [2C]
    H, F, D = Ws.shape
    C = Wo.shape[1]
    # W_flat[f, h*D+d] = Ws[h, f, d]  so that  x @ W_flat == concat_h(x @ W_h)
    w_flat = jnp.transpose(Ws, (1, 0, 2)).reshape(F, H * D)          # [F, H*D]
    # Fold the attention vectors into the weights: wh1 = x @ b1, wh2 = x @ b2
    b1 = jnp.einsum('hfd,hd->fh', Ws, a_hs[:, :D], precision=hi)     # [F, H]
    b2 = jnp.einsum('hfd,hd->fh', Ws, a_hs[:, D:], precision=hi)     # [F, H]
    p1 = jnp.concatenate([w_flat, b1, b2], axis=1)                   # [F, H*D+2H]

    bo1 = jnp.matmul(Wo, a_o[:C], precision=hi)                      # [H*D]
    bo2 = jnp.matmul(Wo, a_o[C:], precision=hi)                      # [H*D]
    p2 = jnp.concatenate([Wo, bo1[:, None], bo2[:, None]], axis=1)   # [H*D, C+2]
    return p1, p2


def prepare_adj(adj):
    """Additive adjacency bias (0 where connected, -9e15 otherwise)."""
    return jnp.where(adj > 0.0, 0.0, NEG_INF).astype(jnp.float32)


def gat_forward(x, adj_bias, p1, p2, *, nheads, nhid, nclass):
    N = x.shape[0]
    vmem = pl.BlockSpec(memory_space=pltpu.MemorySpace.VMEM)
    kernel = functools.partial(gat_kernel, nheads=nheads, nhid=nhid,
                               nclass=nclass, alpha=ALPHA)
    return pl.pallas_call(
        kernel,
        out_shape=jax.ShapeDtypeStruct((N, nclass), jnp.float32),
        in_specs=[vmem] * 4,
        out_specs=vmem,
    )(x, adj_bias, p1, p2)


def gat_reference(x, adj, params, alpha):
    """Pure-JAX reference mirroring the PyTorch GAT forward (eval mode)."""
    Ws, a_hs, Wo, a_o = params
    hi = jax.lax.Precision.HIGHEST
    H, F, D = Ws.shape
    C = Wo.shape[1]

    def leaky(v):
        return jnp.where(v > 0, v, alpha * v)

    def layer(h, W, a, out_f, concat):
        Wh = jnp.matmul(h, W, precision=hi)
        Wh1 = jnp.matmul(Wh, a[:out_f].reshape(out_f, 1), precision=hi)
        Wh2 = jnp.matmul(Wh, a[out_f:].reshape(out_f, 1), precision=hi)
        e = leaky(Wh1 + Wh2.T)
        att = jnp.where(adj > 0, e, NEG_INF)
        att = jax.nn.softmax(att, axis=1)
        hp = jnp.matmul(att, Wh, precision=hi)
        return jax.nn.elu(hp) if concat else hp

    heads = [layer(x, Ws[i], a_hs[i], D, True) for i in range(H)]
    x1 = jnp.concatenate(heads, axis=1)
    out = jax.nn.elu(layer(x1, Wo, a_o, C, False))
    return jax.nn.log_softmax(out, axis=1)


def make_params(key, nfeat, nhid, nclass, nheads):
    def xavier(k, shape, gain=1.414):
        bound = gain * math.sqrt(6.0 / (shape[0] + shape[1]))
        return jax.random.uniform(k, shape, jnp.float32, -bound, bound)

    keys = jax.random.split(key, 2 * nheads + 2)
    Ws = jnp.stack([xavier(keys[i], (nfeat, nhid)) for i in range(nheads)])
    a_hs = jnp.stack([xavier(keys[nheads + i], (2 * nhid, 1))[:, 0]
                      for i in range(nheads)])
    Wo = xavier(keys[-2], (nhid * nheads, nclass))
    a_o = xavier(keys[-1], (2 * nclass, 1))[:, 0]
    return Ws, a_hs, Wo, a_o


if __name__ == "__main__":
    key = jax.random.PRNGKey(0)
    k_p, k_x, k_adj = jax.random.split(key, 3)

    N, NFEAT, NHID, NCLASS, NHEADS = 16, 32, 16, 8, 4
    params = make_params(k_p, NFEAT, NHID, NCLASS, NHEADS)
    x = jax.random.normal(k_x, (N, NFEAT), jnp.float32)
    adj = (jax.random.uniform(k_adj, (N, N)) < 0.4).astype(jnp.float32)
    adj = jnp.maximum(adj, jnp.eye(N, dtype=jnp.float32))   # self-loops

    p1, p2 = prepare_params(params)
    adj_bias = prepare_adj(adj)

    fwd = jax.jit(functools.partial(gat_forward, nheads=NHEADS, nhid=NHID,
                                    nclass=NCLASS))
    out = fwd(x, adj_bias, p1, p2)
    out = jax.block_until_ready(out)

    ref = gat_reference(x, adj, params, ALPHA)
    assert out.shape == (N, NCLASS)
    err = float(jnp.max(jnp.abs(out - ref)))
    assert jnp.allclose(out, ref, rtol=2e-2, atol=2e-2), err

    print("KERNEL_OK")
</pallas_src>

<mosaic_0001>
module attributes {stable_mosaic.version = 11 : i64} {
  func.func @gat_kernel(%arg0: memref<16x32xf32, #tpu.memory_space<vmem>>, %arg1: memref<16x16xf32, #tpu.memory_space<vmem>>, %arg2: memref<32x72xf32, #tpu.memory_space<vmem>>, %arg3: memref<64x10xf32, #tpu.memory_space<vmem>>, %arg4: memref<16x8xf32, #tpu.memory_space<vmem>>) attributes {dimension_semantics = [], scalar_prefetch = 0 : i64, scratch_operands = 0 : i64, tpu.core_type = #tpu.core_type<tc>} {
    %c0 = arith.constant 0 : index
    %c0_0 = arith.constant 0 : index
    %0 = vector.load %arg0[%c0, %c0_0] : memref<16x32xf32, #tpu.memory_space<vmem>>, vector<16x32xf32>
    %c0_1 = arith.constant 0 : index
    %c0_2 = arith.constant 0 : index
    %1 = vector.load %arg1[%c0_1, %c0_2] : memref<16x16xf32, #tpu.memory_space<vmem>>, vector<16x16xf32>
    %c0_3 = arith.constant 0 : index
    %c0_4 = arith.constant 0 : index
    %2 = vector.load %arg2[%c0_3, %c0_4] : memref<32x72xf32, #tpu.memory_space<vmem>>, vector<32x72xf32>
    %cst = arith.constant dense<0.000000e+00> : vector<16x72xf32>
    %3 = tpu.matmul %0, %2, %cst {dimension_numbers = #tpu.dot_dimension_numbers<[1], [0], [0], [1], [0, 0, 1, 1], [], []>} : vector<16x32xf32>, vector<32x72xf32>, vector<16x72xf32> -> vector<16x72xf32>
    %4 = vector.extract_strided_slice %3 {offsets = [0, 0], sizes = [16, 64], strides = [1, 1]} : vector<16x72xf32> to vector<16x64xf32>
    %5 = vector.extract_strided_slice %3 {offsets = [0, 64], sizes = [16, 4], strides = [1, 1]} : vector<16x72xf32> to vector<16x4xf32>
    %6 = tpu.transpose %5, [1, 0] : vector<16x4xf32> -> vector<4x16xf32>
    %7 = vector.extract_strided_slice %3 {offsets = [0, 68], sizes = [16, 4], strides = [1, 1]} : vector<16x72xf32> to vector<16x4xf32>
    %8 = tpu.transpose %7, [1, 0] : vector<16x4xf32> -> vector<4x16xf32>
    %9 = vector.shape_cast %6 : vector<4x16xf32> to vector<4x16x1xf32>
    %10 = vector.shape_cast %8 : vector<4x16xf32> to vector<4x1x16xf32>
    %11 = vector.broadcast %9 : vector<4x16x1xf32> to vector<4x16x16xf32>
    %12 = vector.broadcast %10 : vector<4x1x16xf32> to vector<4x16x16xf32>
    %13 = arith.addf %11, %12 : vector<4x16x16xf32>
    %cst_5 = arith.constant 2.000000e-01 : f32
    %14 = vector.broadcast %cst_5 : f32 to vector<4x16x16xf32>
    %15 = arith.mulf %14, %13 : vector<4x16x16xf32>
    %16 = arith.maximumf %13, %15 : vector<4x16x16xf32>
    %17 = vector.shape_cast %1 : vector<16x16xf32> to vector<1x16x16xf32>
    %18 = vector.broadcast %17 : vector<1x16x16xf32> to vector<4x16x16xf32>
    %19 = arith.addf %16, %18 : vector<4x16x16xf32>
    %cst_6 = arith.constant dense<0xFF800000> : vector<4x16xf32>
    %20 = vector.multi_reduction <maximumf>, %19, %cst_6 [2] : vector<4x16x16xf32> to vector<4x16xf32>
    %21 = vector.shape_cast %20 : vector<4x16xf32> to vector<4x16x1xf32>
    %22 = vector.broadcast %21 : vector<4x16x1xf32> to vector<4x16x16xf32>
    %23 = arith.subf %19, %22 : vector<4x16x16xf32>
    %24 = math.exp %23 : vector<4x16x16xf32>
    %cst_7 = arith.constant dense<0.000000e+00> : vector<4x16xf32>
    %25 = vector.multi_reduction <add>, %24, %cst_7 [2] : vector<4x16x16xf32> to vector<4x16xf32>
    %26 = vector.shape_cast %25 : vector<4x16xf32> to vector<4x16x1xf32>
    %27 = tpu.reciprocal %26 {approx = true} : vector<4x16x1xf32> -> vector<4x16x1xf32>
    %28 = vector.broadcast %27 : vector<4x16x1xf32> to vector<4x16x16xf32>
    %29 = arith.mulf %24, %28 : vector<4x16x16xf32>
    %30 = vector.extract_strided_slice %29 {offsets = [0, 0, 0], sizes = [1, 16, 16], strides = [1, 1, 1]} : vector<4x16x16xf32> to vector<1x16x16xf32>
    %31 = vector.shape_cast %30 : vector<1x16x16xf32> to vector<16x16xf32>
    %32 = vector.extract_strided_slice %4 {offsets = [0, 0], sizes = [16, 16], strides = [1, 1]} : vector<16x64xf32> to vector<16x16xf32>
    %cst_8 = arith.constant dense<0.000000e+00> : vector<16x16xf32>
    %33 = tpu.matmul %31, %32, %cst_8 {dimension_numbers = #tpu.dot_dimension_numbers<[1], [0], [0], [1], [0, 0, 1, 1], [], []>} : vector<16x16xf32>, vector<16x16xf32>, vector<16x16xf32> -> vector<16x16xf32>
    %34 = vector.extract_strided_slice %29 {offsets = [1, 0, 0], sizes = [1, 16, 16], strides = [1, 1, 1]} : vector<4x16x16xf32> to vector<1x16x16xf32>
    %35 = vector.shape_cast %34 : vector<1x16x16xf32> to vector<16x16xf32>
    %36 = vector.extract_strided_slice %4 {offsets = [0, 16], sizes = [16, 16], strides = [1, 1]} : vector<16x64xf32> to vector<16x16xf32>
    %cst_9 = arith.constant dense<0.000000e+00> : vector<16x16xf32>
    %37 = tpu.matmul %35, %36, %cst_9 {dimension_numbers = #tpu.dot_dimension_numbers<[1], [0], [0], [1], [0, 0, 1, 1], [], []>} : vector<16x16xf32>, vector<16x16xf32>, vector<16x16xf32> -> vector<16x16xf32>
    %38 = vector.extract_strided_slice %29 {offsets = [2, 0, 0], sizes = [1, 16, 16], strides = [1, 1, 1]} : vector<4x16x16xf32> to vector<1x16x16xf32>
    %39 = vector.shape_cast %38 : vector<1x16x16xf32> to vector<16x16xf32>
    %40 = vector.extract_strided_slice %4 {offsets = [0, 32], sizes = [16, 16], strides = [1, 1]} : vector<16x64xf32> to vector<16x16xf32>
    %cst_10 = arith.constant dense<0.000000e+00> : vector<16x16xf32>
    %41 = tpu.matmul %39, %40, %cst_10 {dimension_numbers = #tpu.dot_dimension_numbers<[1], [0], [0], [1], [0, 0, 1, 1], [], []>} : vector<16x16xf32>, vector<16x16xf32>, vector<16x16xf32> -> vector<16x16xf32>
    %42 = vector.extract_strided_slice %29 {offsets = [3, 0, 0], sizes = [1, 16, 16], strides = [1, 1, 1]} : vector<4x16x16xf32> to vector<1x16x16xf32>
    %43 = vector.shape_cast %42 : vector<1x16x16xf32> to vector<16x16xf32>
    %44 = vector.extract_strided_slice %4 {offsets = [0, 48], sizes = [16, 16], strides = [1, 1]} : vector<16x64xf32> to vector<16x16xf32>
    %cst_11 = arith.constant dense<0.000000e+00> : vector<16x16xf32>
    %45 = tpu.matmul %43, %44, %cst_11 {dimension_numbers = #tpu.dot_dimension_numbers<[1], [0], [0], [1], [0, 0, 1, 1], [], []>} : vector<16x16xf32>, vector<16x16xf32>, vector<16x16xf32> -> vector<16x16xf32>
    %46 = tpu.concatenate %33, %37, %41, %45 in 1 : vector<16x16xf32>, vector<16x16xf32>, vector<16x16xf32>, vector<16x16xf32> -> vector<16x64xf32>
    %cst_12 = arith.constant 0.000000e+00 : f32
    %47 = vector.broadcast %cst_12 : f32 to vector<16x64xf32>
    %48 = arith.cmpf ogt, %46, %47 : vector<16x64xf32>
    %cst_13 = arith.constant 0.000000e+00 : f32
    %49 = vector.broadcast %cst_13 : f32 to vector<16x64xf32>
    %50 = arith.minimumf %46, %49 : vector<16x64xf32>
    %51 = math.exp %50 : vector<16x64xf32>
    %cst_14 = arith.constant 1.000000e+00 : f32
    %52 = vector.broadcast %cst_14 : f32 to vector<16x64xf32>
    %53 = arith.subf %51, %52 : vector<16x64xf32>
    %54 = arith.select %48, %46, %53 : vector<16x64xi1>, vector<16x64xf32>
    %c0_15 = arith.constant 0 : index
    %c0_16 = arith.constant 0 : index
    %55 = vector.load %arg3[%c0_15, %c0_16] : memref<64x10xf32, #tpu.memory_space<vmem>>, vector<64x10xf32>
    %cst_17 = arith.constant dense<0.000000e+00> : vector<16x10xf32>
    %56 = tpu.matmul %54, %55, %cst_17 {dimension_numbers = #tpu.dot_dimension_numbers<[1], [0], [0], [1], [0, 0, 1, 1], [], []>} : vector<16x64xf32>, vector<64x10xf32>, vector<16x10xf32> -> vector<16x10xf32>
    %57 = vector.extract_strided_slice %56 {offsets = [0, 0], sizes = [16, 8], strides = [1, 1]} : vector<16x10xf32> to vector<16x8xf32>
    %58 = vector.extract_strided_slice %56 {offsets = [0, 8], sizes = [16, 1], strides = [1, 1]} : vector<16x10xf32> to vector<16x1xf32>
    %59 = vector.extract_strided_slice %56 {offsets = [0, 9], sizes = [16, 1], strides = [1, 1]} : vector<16x10xf32> to vector<16x1xf32>
    %60 = tpu.transpose %59, [1, 0] : vector<16x1xf32> -> vector<1x16xf32>
    %61 = vector.broadcast %58 : vector<16x1xf32> to vector<16x16xf32>
    %62 = vector.broadcast %60 : vector<1x16xf32> to vector<16x16xf32>
    %63 = arith.addf %61, %62 : vector<16x16xf32>
    %cst_18 = arith.constant 2.000000e-01 : f32
    %64 = vector.broadcast %cst_18 : f32 to vector<16x16xf32>
    %65 = arith.mulf %64, %63 : vector<16x16xf32>
    %66 = arith.maximumf %63, %65 : vector<16x16xf32>
    %67 = arith.addf %66, %1 : vector<16x16xf32>
    %cst_19 = arith.constant dense<0xFF800000> : vector<16xf32>
    %68 = vector.multi_reduction <maximumf>, %67, %cst_19 [1] : vector<16x16xf32> to vector<16xf32>
    %69 = vector.shape_cast %68 : vector<16xf32> to vector<16x1xf32>
    %70 = vector.broadcast %69 : vector<16x1xf32> to vector<16x16xf32>
    %71 = arith.subf %67, %70 : vector<16x16xf32>
    %72 = math.exp %71 : vector<16x16xf32>
    %cst_20 = arith.constant dense<0.000000e+00> : vector<16xf32>
    %73 = vector.multi_reduction <add>, %72, %cst_20 [1] : vector<16x16xf32> to vector<16xf32>
    %74 = vector.shape_cast %73 : vector<16xf32> to vector<16x1xf32>
    %75 = tpu.reciprocal %74 {approx = true} : vector<16x1xf32> -> vector<16x1xf32>
    %76 = vector.broadcast %75 : vector<16x1xf32> to vector<16x16xf32>
    %77 = arith.mulf %72, %76 : vector<16x16xf32>
    %cst_21 = arith.constant dense<0.000000e+00> : vector<16x8xf32>
    %78 = tpu.matmul %77, %57, %cst_21 {dimension_numbers = #tpu.dot_dimension_numbers<[1], [0], [0], [1], [0, 0, 1, 1], [], []>} : vector<16x16xf32>, vector<16x8xf32>, vector<16x8xf32> -> vector<16x8xf32>
    %cst_22 = arith.constant 0.000000e+00 : f32
    %79 = vector.broadcast %cst_22 : f32 to vector<16x8xf32>
    %80 = arith.cmpf ogt, %78, %79 : vector<16x8xf32>
    %cst_23 = arith.constant 0.000000e+00 : f32
    %81 = vector.broadcast %cst_23 : f32 to vector<16x8xf32>
    %82 = arith.minimumf %78, %81 : vector<16x8xf32>
    %83 = math.exp %82 : vector<16x8xf32>
    %cst_24 = arith.constant 1.000000e+00 : f32
    %84 = vector.broadcast %cst_24 : f32 to vector<16x8xf32>
    %85 = arith.subf %83, %84 : vector<16x8xf32>
    %86 = arith.select %80, %78, %85 : vector<16x8xi1>, vector<16x8xf32>
    %cst_25 = arith.constant dense<0xFF800000> : vector<16xf32>
    %87 = vector.multi_reduction <maximumf>, %86, %cst_25 [1] : vector<16x8xf32> to vector<16xf32>
    %88 = vector.shape_cast %87 : vector<16xf32> to vector<16x1xf32>
    %89 = vector.broadcast %88 : vector<16x1xf32> to vector<16x8xf32>
    %90 = arith.subf %86, %89 : vector<16x8xf32>
    %91 = math.exp %90 : vector<16x8xf32>
    %cst_26 = arith.constant dense<0.000000e+00> : vector<16xf32>
    %92 = vector.multi_reduction <add>, %91, %cst_26 [1] : vector<16x8xf32> to vector<16xf32>
    %93 = vector.shape_cast %92 : vector<16xf32> to vector<16x1xf32>
    %94 = math.log %93 : vector<16x1xf32>
    %95 = vector.broadcast %94 : vector<16x1xf32> to vector<16x8xf32>
    %96 = arith.subf %90, %95 : vector<16x8xf32>
    %c0_27 = arith.constant 0 : index
    %c0_28 = arith.constant 0 : index
    %97 = vector.load %arg4[%c0_27, %c0_28] : memref<16x8xf32, #tpu.memory_space<vmem>>, vector<16x8xf32>
    tpu.vector_store %arg4[%c0_27, %c0_28], %96 {strides = array<i32>} : memref<16x8xf32, #tpu.memory_space<vmem>>, vector<16x8xf32>,
    return
  }
}

</mosaic_0001>

<bundles_post_ra>
// kernel: gat_forward.1
= control target key start
LH: loop header
LB: loop body
LE: loop exit
PB: predicated region body
PF: predicated region fallthrough
CT: control target
= control target key end

     0   :  { %vm25_vm0 = vcmask 261120   ;;  %s1265_s27 = smov 60   ;;  %v185_v10 = vlaneseq  ;;  %v1267_v29 = vmov 1966171168   ;;  %vm306_vm1 = vcmask 130048   ;;  %s1269_s5 = smov 96   ;;  %s1445_s2 = inlined_call_operand.vmem [shape: f32[32,72], index: 2, kind: input, shape index: {}]   ;;  %s1446_s0 = inlined_call_operand.vmem [shape: f32[16,32], index: 0, kind: input, shape index: {}]   ;;  %s1447_s1 = inlined_call_operand.vmem [shape: f32[16,16], index: 1, kind: input, shape index: {}]   ;;  %s1448_s3 = inlined_call_operand.vmem [shape: f32[64,10], index: 3, kind: input, shape index: {}]   ;;  %s1449_s4 = inlined_call_operand.vmem [shape: f32[16,8], index: 4, kind: output, shape index: {}]  }
   0x1   :  { %v24_v0 = vld [vmem:[%s1445_s2 + $0x18] sm:$0xff]  ;;  %v23_v1 = vld [vmem:[%s1445_s2 + $0x10] sm:$0xff]  ;;  %v17_v2 = vld [vmem:[%s1446_s0] sm:$0xff]  ;;  %v231_v30 = vunpack.c.l.s4 %v1267_v29  ;;  %s1270_s6 = smov 80   ;;  %s1271_s7 = smov 32   ;;  %vm765_vm2 = vcmask 392192  }
   0x2   :  { %1130 = vmatprep.subr.mxu1 %v24_v0  ;;  %v22_v3 = vld [vmem:[%s1445_s2 + $0x8] sm:$0xff]  ;;  %1138 = vmatprep.mubr.msk.f32.mxu1 %vm25_vm0, %v17_v2  ;;  %v21_v4 = vld [vmem:[%s1445_s2] sm:$0xff]  ;;  %s1266_s2 = smov 64   ;;  %v186_v11 = vshrl.u32 %v185_v10, 7  ;;  %s1272_s8 = smov 16   ;;  %vm788_vm3 = vcmask 523264  }
   0x3   :  { %1131 = vmatpush3.msra.mxu1 %v24_v0  ;;  %v18_v5 = vld [vmem:[%s1446_s0 + $0x8] sm:$0xff]  ;;  %v232_v32 = vunpack.c.0.s8 %v231_v30  ;;  %v1347_v53 = vld [vmem:[%s1447_s1] sm:$0xff]  ;;  %s1273_s13 = smov 48   ;;  %vm1045_vm6 = vcmask 64512  }
   0x4   :  { %1132 = vmatprep.subr.mxu1 %v23_v1  ;;  %v1333_v12 = vsub.s32 0, %v186_v11  ;;  %v198_v15 = vsub.s32 1, %v186_v11  ;;  %v209_v17 = vsub.s32 2, %v186_v11  ;;  %v220_v19 = vsub.s32 3, %v186_v11  ;;  %v1342_v49 = vld [vmem:[%s1447_s1 + $0x8] sm:$0xff]  ;;  %s1268_s1 = smov 112  }
   0x5   :  { %1133 = vmatpush3.msra.mxu1 %v23_v1  ;;  %v235_v34 = vsub.s32 %v232_v32, %v186_v11 }
   0x6   :  { %1134 = vmatprep.subr.mxu1 %v22_v3 }
   0x7   :  { %1135 = vmatpush3.msra.mxu1 %v22_v3 }
   0x8   :  { %1136 = vmatprep.subr.mxu1 %v21_v4 }
   0x9   :  { %1137 = vmatpush3.msra.mxu1 %v21_v4 }
   0xa   :  { %1139 = vmatmul.mubr.msk.f32.vlgmr.msra.gmra.mxu1 %vm25_vm0, %v18_v5 }
  0xca   :  { %v1321_v6 = vpop.f32.mrf.mxu1 }
  0xcb   :  { %149 = vrot.lane.b32.xlu1 %v1321_v6, %s1265_s27  ;;  %1141 = vmatprep.subr.mxu1 %v1321_v6 }
  0xcc   :  { %v1325_v7 = vpop.f32.mrf.mxu1  ;;  %1142 = vmatpush3.msra.mxu1 %v1321_v6 }
  0xcd   :  { %109 = vrot.lane.b32.xlu0 %v1325_v7, %s1266_s2  ;;  %1143 = vmatprep.subr.mxu1 %v1325_v7 }
  0xce   :  { %1144 = vmatpush3.msra.mxu1 %v1325_v7 }
  0xcf   :  { %147 = vrot.lane.b32.xlu1 %v1325_v7, %s1265_s27 }
  0xd1   :  { %111 = vrot.lane.b32.xlu0 %v1321_v6, %s1266_s2 }
 0x13d   :  { %v150_v21 = vpop.permute.xlu1 %149 }
 0x13f   :  { %v110_v8 = vpop.permute.xlu0 %109 }
 0x140   :  { %115 = vxpose.xlu0.b32.start [1/2] (short) (narrow) %v110_v8, 8 }
 0x141   :  { %v148_v22 = vpop.permute.xlu1 %147 }
 0x143   :  { %v112_v9 = vpop.permute.xlu0 %111 }
 0x144   :  { %116 = vxpose.xlu0.b32.end [2/2] (short) (narrow) %v112_v9, 8 }
 0x1bc   :  { %v131_v13 = vpop.trf.xlu0 }
 0x1bd   :  { %v188_v14 = vrot.slane %v131_v13, %v1333_v12  ;;  %v199_v16 = vrot.slane %v131_v13, %v198_v15  ;;  %v210_v18 = vrot.slane %v131_v13, %v209_v17  ;;  %v221_v20 = vrot.slane %v131_v13, %v220_v19 }
 0x1bf   :  { %190 = vbcast.lane.b32.xlu1 %v188_v14, 256 }
 0x1c3   :  { %194 = vbcast.lane.b32.xlu1 %v188_v14, 264 }
 0x1c7   :  { %201 = vbcast.lane.b32.xlu1 %v199_v16, 256 }
 0x1cb   :  { %205 = vbcast.lane.b32.xlu1 %v199_v16, 264 }
 0x1cf   :  { %212 = vbcast.lane.b32.xlu1 %v210_v18, 256 }
 0x1d3   :  { %216 = vbcast.lane.b32.xlu1 %v210_v18, 264 }
 0x1d7   :  { %223 = vbcast.lane.b32.xlu1 %v221_v20, 256 }
 0x1db   :  { %227 = vbcast.lane.b32.xlu1 %v221_v20, 264 }
 0x204   :  { %153 = vxpose.xlu1.b32.start [1/2] (short) (narrow) %v148_v22, 8 }
 0x208   :  { %154 = vxpose.xlu1.b32.end [2/2] (short) (narrow) %v150_v21, 8 }
 0x231   :  { %v191_v23 = vpop.permute.xlu1 %190 }
 0x235   :  { %v195_v24 = vpop.permute.xlu1 %194 }
 0x239   :  { %v202_v25 = vpop.permute.xlu1 %201 }
 0x23d   :  { %v206_v26 = vpop.permute.xlu1 %205 }
 0x241   :  { %v213_v27 = vpop.permute.xlu1 %212 }
 0x245   :  { %v217_v28 = vpop.permute.xlu1 %216 }
 0x249   :  { %v224_v31 = vpop.permute.xlu1 %223 }
 0x24d   :  { %v228_v33 = vpop.permute.xlu1 %227 }
 0x280   :  { %v169_v35 = vpop.trf.xlu1 }
 0x281   :  { %v236_v36 = vrot.slane %v169_v35, %v235_v34 }
 0x283   :  { %v237_v37 = vcombine.high %v236_v36, %v236_v36  ;;  %v244_v38 = vrot.slane %v236_v36, %v235_v34 }
 0x285   :  { %v251_v39 = vrot.slane %v237_v37, %v235_v34  ;;  %v252_v40 = vcombine.high %v244_v38, %v244_v38  ;;  %v257_v41 = vrot.slane %v244_v38, %v1333_v12 }
 0x287   :  { %v261_v42 = vrot.slane %v251_v39, %v1333_v12  ;;  %v275_v43 = vadd.f32 %v257_v41, %v195_v24  ;;  %v265_v44 = vrot.slane %v252_v40, %v1333_v12  ;;  %v274_v45 = vadd.f32 %v257_v41, %v191_v23 }
 0x288   :  { %v253_v51 = vcombine.high %v251_v39, %v251_v39 }
 0x289   :  { %v283_v46 = vmul.f32 0.2, %v275_v43  ;;  %v276_v47 = vadd.f32 %v261_v42, %v202_v25  ;;  %v277_v48 = vadd.f32 %v261_v42, %v206_v26  ;;  %v282_v50 = vmul.f32 0.2, %v274_v45 }
 0x28a   :  { %v278_v57 = vadd.f32 %v265_v44, %v213_v27  ;;  %v279_v62 = vadd.f32 %v265_v44, %v217_v28  ;;  %v269_v63 = vrot.slane %v253_v51, %v1333_v12 }
 0x28b   :  { %v291_v52 = vmax.f32 %v275_v43, %v283_v46  ;;  %v284_v54 = vmul.f32 0.2, %v276_v47  ;;  %v290_v55 = vmax.f32 %v274_v45, %v282_v50  ;;  %v285_v56 = vmul.f32 0.2, %v277_v48 }
 0x28c   :  { %v286_v3 = vmul.f32 0.2, %v278_v57  ;;  %v287_v4 = vmul.f32 0.2, %v279_v62  ;;  %v280_v10 = vadd.f32 %v269_v63, %v224_v31  ;;  %v281_v11 = vadd.f32 %v269_v63, %v228_v33 }
 0x28d   :  { %v299_v58 = vadd.f32 %v291_v52, %v1342_v49  ;;  %v292_v59 = vmax.f32 %v276_v47, %v284_v54  ;;  %v298_v60 = vadd.f32 %v290_v55, %v1347_v53  ;;  %v293_v2 = vmax.f32 %v277_v48, %v285_v56 }
 0x28e   :  { %v294_v9 = vmax.f32 %v278_v57, %v286_v3  ;;  %v295_v15 = vmax.f32 %v279_v62, %v287_v4  ;;  %v288_v16 = vmul.f32 0.2, %v280_v10  ;;  %v289_v20 = vmul.f32 0.2, %v281_v11 }
 0x28f   :  { %v310_v61 = vsel %vm306_vm1, %v299_v58, -inf  ;;  %v307_v0 = vsel %vm306_vm1, %v298_v60, -inf  ;;  %v300_v1 = vadd.f32 %v292_v59, %v1347_v53  ;;  %v301_v8 = vadd.f32 %v293_v2, %v1342_v49 }
 0x290   :  { %311 = vmax.xlane.f32.xlu1 %v310_v61  ;;  %308 = vmax.xlane.f32.xlu0 %v307_v0  ;;  %v302_v14 = vadd.f32 %v294_v9, %v1347_v53  ;;  %v303_v18 = vadd.f32 %v295_v15, %v1342_v49  ;;  %v296_v19 = vmax.f32 %v280_v10, %v288_v16 }
 0x291   :  { %v313_v5 = vsel %vm306_vm1, %v300_v1, -inf  ;;  %v316_v13 = vsel %vm306_vm1, %v301_v8, -inf  ;;  %v297_v23 = vmax.f32 %v281_v11, %v289_v20 }
 0x292   :  { %v319_v17 = vsel %vm306_vm1, %v302_v14, -inf  ;;  %v322_v21 = vsel %vm306_vm1, %v303_v18, -inf  ;;  %v304_v22 = vadd.f32 %v296_v19, %v1347_v53 }
 0x293   :  { %v305_v25 = vadd.f32 %v297_v23, %v1342_v49 }
 0x294   :  { %314 = vmax.xlane.f32.xlu0 %v313_v5  ;;  %v325_v24 = vsel %vm306_vm1, %v304_v22, -inf }
 0x295   :  { %v328_v26 = vsel %vm306_vm1, %v305_v25, -inf }
 0x298   :  { %317 = vmax.xlane.f32.xlu0 %v316_v13 }
 0x29c   :  { %320 = vmax.xlane.f32.xlu0 %v319_v17 }
 0x2a0   :  { %323 = vmax.xlane.f32.xlu0 %v322_v21 }
 0x2a1   :  { %478 = vrot.lane.b32.xlu1 %v1321_v6, %s1268_s1 }
 0x2a4   :  { %326 = vmax.xlane.f32.xlu0 %v325_v24 }
 0x2a5   :  { %565 = vrot.lane.b32.xlu1 %v1321_v6, %s1269_s5 }
 0x2a8   :  { %329 = vmax.xlane.f32.xlu0 %v328_v26 }
 0x2a9   :  { %652 = vrot.lane.b32.xlu1 %v1321_v6, %s1270_s6 }
 0x2be   :  { %476 = vrot.lane.b32.xlu0 %v1325_v7, %s1268_s1 }
 0x319   :  { %v312_v27 = vpop.xlane.xlu1 %311  ;;  %v309_v29 = vpop.xlane.xlu0 %308 }
 0x31a   :  { %v332_v28 = vsub.f32 %v299_v58, %v312_v27  ;;  %v331_v30 = vsub.f32 %v298_v60, %v309_v29 }
 0x31c   :  { %v341_v31 = vmul.f32 1.442695, %v332_v28  ;;  %v339_v32 = vmul.f32 1.442695, %v331_v30 }
 0x31d   :  { %v1372_v33 = vpop.permute.xlu1 %478  ;;  %v315_v34 = vpop.xlane.xlu0 %314 }
 0x31e   :  { %1148 = vmatprep.subr.mxu1 %v1372_v33  ;;  %1209 = vpow2.f32 %v339_v32  ;;  %v333_v35 = vsub.f32 %v300_v1, %v315_v34 }
 0x31f   :  { %1211 = vpow2.f32 %v341_v31 }
 0x320   :  { %v343_v36 = vmul.f32 1.442695, %v333_v35 }
 0x321   :  { %v566_v37 = vpop.permute.xlu1 %565  ;;  %v318_v38 = vpop.xlane.xlu0 %317 }
 0x322   :  { %1155 = vmatprep.subr.mxu0 %v566_v37  ;;  %v334_v6 = vsub.f32 %v301_v8, %v318_v38  ;;  %1213 = vpow2.f32 %v343_v36 }
 0x323   :  { %1156 = vmatpush3.msra.mxu0 %v566_v37 }
 0x324   :  { %v345_v39 = vmul.f32 1.442695, %v334_v6 }
 0x325   :  { %v321_v40 = vpop.xlane.xlu0 %320  ;;  %v653_v11 = vpop.permute.xlu1 %652 }
 0x326   :  { %v335_v41 = vsub.f32 %v302_v14, %v321_v40  ;;  %1215 = vpow2.f32 %v345_v39 }
 0x328   :  { %v347_v42 = vmul.f32 1.442695, %v335_v41  ;;  %v787_v41 = vld [vmem:[%s1448_s3 + $0x38] sm:$0xff] }
 0x329   :  { %v324_v43 = vpop.xlane.xlu0 %323 }
 0x32a   :  { %1217 = vpow2.f32 %v347_v42  ;;  %v336_v44 = vsub.f32 %v303_v18, %v324_v43  ;;  %v786_v43 = vld [vmem:[%s1448_s3 + $0x30] sm:$0xff] }
 0x32b   :  { %v1210_v45 = vpop.eup %1209 }
 0x32c   :  { %v349_v46 = vmul.f32 1.442695, %v336_v44  ;;  %v355_v47 = vsel %vm306_vm1, %v1210_v45, 0.0  ;;  %v1212_v48 = vpop.eup %1211 }
 0x32d   :  { %356 = vadd.xlane.f32.xlu0 %v355_v47  ;;  %v327_v50 = vpop.xlane.xlu0 %326  ;;  %v358_v54 = vsel %vm306_vm1, %v1212_v48, 0.0  ;;  %v783_v47 = vld [vmem:[%s1448_s3 + $0x18] sm:$0xff] }
 0x32e   :  { %1219 = vpow2.f32 %v349_v46  ;;  %v337_v51 = vsub.f32 %v304_v22, %v327_v50  ;;  %v784_v46 = vld [vmem:[%s1448_s3 + $0x20] sm:$0xff]  ;;  %v781_v50 = vld [vmem:[%s1448_s3 + $0x8] sm:$0xff] }
 0x32f   :  { %v1214_v55 = vpop.eup %1213 }
 0x330   :  { %v351_v52 = vmul.f32 1.442695, %v337_v51  ;;  %v361_v59 = vsel %vm306_vm1, %v1214_v55, 0.0  ;;  %v780_v51 = vld [vmem:[%s1448_s3] sm:$0xff] }
 0x331   :  { %359 = vadd.xlane.f32.xlu0 %v358_v54  ;;  %v330_v56 = vpop.xlane.xlu0 %329 }
 0x332   :  { %1221 = vpow2.f32 %v351_v52  ;;  %v338_v57 = vsub.f32 %v305_v25, %v330_v56 }
 0x333   :  { %v1216_v60 = vpop.eup %1215 }
 0x334   :  { %v353_v58 = vmul.f32 1.442695, %v338_v57  ;;  %v364_v63 = vsel %vm306_vm1, %v1216_v60, 0.0 }
 0x335   :  { %362 = vadd.xlane.f32.xlu0 %v361_v59  ;;  %v477_v8 = vpop.permute.xlu0 %476 }
 0x336   :  { %1223 = vpow2.f32 %v353_v58 }
 0x337   :  { %v1218_v61 = vpop.eup %1217 }
 0x338   :  { %v367_v62 = vsel %vm306_vm1, %v1218_v61, 0.0 }
 0x339   :  { %368 = vadd.xlane.f32.xlu1 %v367_v62  ;;  %365 = vadd.xlane.f32.xlu0 %v364_v63 }
 0x33b   :  { %v1220_v0 = vpop.eup %1219 }
 0x33c   :  { %v370_v1 = vsel %vm306_vm1, %v1220_v0, 0.0 }
 0x33d   :  { %371 = vadd.xlane.f32.xlu0 %v370_v1 }
 0x33f   :  { %v1222_v2 = vpop.eup %1221 }
 0x340   :  { %v373_v3 = vsel %vm306_vm1, %v1222_v2, 0.0 }
 0x341   :  { %374 = vadd.xlane.f32.xlu1 %v373_v3 }
 0x343   :  { %v1224_v4 = vpop.eup %1223 }
 0x344   :  { %v376_v5 = vsel %vm306_vm1, %v1224_v4, 0.0 }
 0x345   :  { %377 = vadd.xlane.f32.xlu0 %v376_v5 }
 0x352   :  { %650 = vrot.lane.b32.xlu1 %v1325_v7, %s1270_s6 }
 0x35b   :  { %563 = vrot.lane.b32.xlu0 %v1325_v7, %s1269_s5 }
 0x3b6   :  { %v357_v9 = vpop.xlane.xlu0 %356 }
 0x3b7   :  { %1225 = vrcp.f32 %v357_v9 }
 0x3ba   :  { %v360_v10 = vpop.xlane.xlu0 %359 }
 0x3bb   :  { %1227 = vrcp.f32 %v360_v10 }
 0x3be   :  { %v363_v13 = vpop.xlane.xlu0 %362 }
 0x3bf   :  { %1229 = vrcp.f32 %v363_v13 }
 0x3c2   :  { %v369_v14 = vpop.xlane.xlu1 %368  ;;  %v366_v15 = vpop.xlane.xlu0 %365 }
 0x3c3   :  { %1231 = vrcp.f32 %v369_v14  ;;  %v1274_v14 = vmov 8  }
 0x3c4   :  { %v1226_v16 = vpop.eup %1225  ;;  %1233 = vrcp.f32 %v366_v15  ;;  %1208 = vset.pattern.permute.xlu1 %v1274_v14  ;;  %1207 = vset.pattern.permute.xlu0 %v1274_v14 }
 0x3c5   :  { %v387_v17 = vmul.f32 %v1226_v16, %v1210_v45  ;;  %v785_v45 = vld [vmem:[%s1448_s3 + $0x28] sm:$0xff] }
 0x3c6   :  { %v372_v18 = vpop.xlane.xlu0 %371 }
 0x3c7   :  { %1235 = vrcp.f32 %v372_v18  ;;  %1145 = vmatprep.mubr.msk.f32.mxu1 %vm306_vm1, %v387_v17 }
 0x3c8   :  { %v1228_v19 = vpop.eup %1227 }
 0x3c9   :  { %v388_v7 = vmul.f32 %v1228_v19, %v1212_v48  ;;  %v782_v48 = vld [vmem:[%s1448_s3 + $0x10] sm:$0xff]  ;;  %s1275_s3 = smov 119  }
 0x3ca   :  { %v375_v20 = vpop.xlane.xlu1 %374 }
 0x3cb   :  { %1237 = vrcp.f32 %v375_v20  ;;  %1146 = vmatmul.mubr.msk.f32.vlgmr.msra.gmra.mxu1 %vm306_vm1, %v388_v7 }
 0x3cc   :  { %v1230_v21 = vpop.eup %1229  ;;  %1149 = vmatpush3.msra.mxu1 %v1372_v33 }
 0x3cd   :  { %1150 = vmatprep.subr.mxu1 %v477_v8  ;;  %v389_v22 = vmul.f32 %v1230_v21, %v1214_v55 }
 0x3ce   :  { %1151 = vmatpush3.msra.mxu1 %v477_v8  ;;  %v378_v23 = vpop.xlane.xlu0 %377  ;;  %v651_v30 = vpop.permute.xlu1 %650 }
 0x3cf   :  { %1239 = vrcp.f32 %v378_v23  ;;  %1162 = vmatprep.subr.mxu1 %v653_v11  ;;  %1152 = vmatprep.mubr.msk.f32.mxu1 %vm306_vm1, %v389_v22 }
 0x3d0   :  { %v1232_v24 = vpop.eup %1231 }
 0x3d1   :  { %v1234_v25 = vpop.eup %1233  ;;  %v391_v26 = vmul.f32 %v1232_v24, %v1218_v61 }
 0x3d2   :  { %v564_v27 = vpop.permute.xlu0 %563  ;;  %v390_v28 = vmul.f32 %v1234_v25, %v1216_v60 }
 0x3d3   :  { %1157 = vmatprep.subr.mxu0 %v564_v27  ;;  %1159 = vmatprep.mubr.msk.f32.mxu0 %vm306_vm1, %v391_v26 }
 0x3d4   :  { %v1236_v29 = vpop.eup %1235  ;;  %1153 = vmatmul.mubr.msk.f32.vlgmr.msra.gmra.mxu1 %vm306_vm1, %v390_v28  ;;  %1158 = vmatpush3.msra.mxu0 %v564_v27 }
 0x3d5   :  { %1163 = vmatpush3.msra.mxu1 %v653_v11  ;;  %v392_v31 = vmul.f32 %v1236_v29, %v1220_v0  ;;  %1169 = vmatprep.subr.mxu0 %v787_v41 }
 0x3d6   :  { %1164 = vmatprep.subr.mxu1 %v651_v30 }
 0x3d7   :  { %1165 = vmatpush3.msra.mxu1 %v651_v30  ;;  %1160 = vmatmul.mubr.msk.f32.vlgmr.msra.gmra.mxu0 %vm306_vm1, %v392_v31 }
 0x3d8   :  { %v1238_v32 = vpop.eup %1237  ;;  %1170 = vmatpush3.msra.mxu0 %v787_v41 }
 0x3d9   :  { %v393_v33 = vmul.f32 %v1238_v32, %v1222_v2  ;;  %1171 = vmatprep.subr.mxu0 %v786_v43 }
 0x3da   :  { %1172 = vmatpush3.msra.mxu0 %v786_v43 }
 0x3db   :  { %1166 = vmatprep.mubr.msk.f32.mxu1 %vm306_vm1, %v393_v33  ;;  %1173 = vmatprep.subr.mxu0 %v785_v45 }
 0x3dc   :  { %v1240_v34 = vpop.eup %1239  ;;  %1174 = vmatpush3.msra.mxu0 %v785_v45 }
 0x3dd   :  { %v394_v35 = vmul.f32 %v1240_v34, %v1224_v4  ;;  %1175 = vmatprep.subr.mxu0 %v784_v46 }
 0x3de   :  { %1176 = vmatpush3.msra.mxu0 %v784_v46 }
 0x3df   :  { %1167 = vmatmul.mubr.msk.f32.vlgmr.msra.gmra.mxu1 %vm306_vm1, %v394_v35  ;;  %1177 = vmatprep.subr.mxu0 %v783_v47 }
 0x3e0   :  { %1178 = vmatpush3.msra.mxu0 %v783_v47 }
 0x3e1   :  { %1179 = vmatprep.subr.mxu0 %v782_v48 }
 0x3e2   :  { %1180 = vmatpush3.msra.mxu0 %v782_v48 }
 0x3e3   :  { %1181 = vmatprep.subr.mxu0 %v781_v50 }
 0x3e4   :  { %1182 = vmatpush3.msra.mxu0 %v781_v50 }
 0x3e5   :  { %1183 = vmatprep.subr.mxu0 %v780_v51 }
 0x3e6   :  { %1184 = vmatpush3.msra.mxu0 %v780_v51 }
 0x48b   :  { %v1147_v36 = vpop.f32.mrf.mxu1 }
 0x48d   :  { %v467_v37 = vpop.f32.mrf.mxu1 }
 0x494   :  { %v1154_v6 = vpop.f32.mrf.mxu1 }
 0x496   :  { %v554_v40 = vpop.f32.mrf.mxu1 }
 0x497   :  { %v1161_v38 = vpop.f32.mrf.mxu0 }
 0x498   :  { %749 = vrot.lane.b32.xlu1 %v1161_v38, %s1271_s7 }
 0x499   :  { %v641_v39 = vpop.f32.mrf.mxu0 }
 0x49a   :  { %747 = vrot.lane.b32.xlu0 %v641_v39, %s1271_s7 }
 0x49c   :  { %741 = vrot.lane.b32.xlu1 %v1154_v6, %s1272_s8 }
 0x49e   :  { %739 = vrot.lane.b32.xlu0 %v554_v40, %s1272_s8 }
 0x49f   :  { %v1168_v42 = vpop.f32.mrf.mxu1 }
 0x4a0   :  { %757 = vrot.lane.b32.xlu1 %v1168_v42, %s1273_s13 }
 0x4a1   :  { %v728_v44 = vpop.f32.mrf.mxu1 }
 0x4a2   :  { %755 = vrot.lane.b32.xlu0 %v728_v44, %s1273_s13 }
 0x50a   :  { %v750_v52 = vpop.permute.xlu1 %749 }
 0x50c   :  { %v748_v54 = vpop.permute.xlu0 %747 }
 0x50e   :  { %v742_v55 = vpop.permute.xlu1 %741 }
 0x50f   :  { %v762_v56 = vsel %vm306_vm1, %v1147_v36, %v742_v55 }
 0x510   :  { %v740_v57 = vpop.permute.xlu0 %739  ;;  %v764_v59 = vsel %vm25_vm0, %v762_v56, %v750_v52 }
 0x511   :  { %v761_v58 = vsel %vm306_vm1, %v467_v37, %v740_v57 }
 0x512   :  { %v758_v60 = vpop.permute.xlu1 %757  ;;  %v763_v63 = vsel %vm25_vm0, %v761_v58, %v748_v54 }
 0x513   :  { %v767_v61 = vsel %vm765_vm2, %v764_v59, %v758_v60 }
 0x514   :  { %v771_v62 = vmin.f32 %v767_v61, 0.0  ;;  %v756_v0 = vpop.permute.xlu0 %755  ;;  %vm769_vm5 = vcmp.gt.f32.partialorder %v767_v61, 0.0 }
 0x515   :  { %v766_v1 = vsel %vm765_vm2, %v763_v63, %v756_v0 }
 0x516   :  { %v774_v2 = vmul.f32 1.442695, %v771_v62  ;;  %v770_v3 = vmin.f32 %v766_v1, 0.0  ;;  %vm768_vm4 = vcmp.gt.f32.partialorder %v766_v1, 0.0 }
 0x518   :  { %1241 = vpow2.f32 %v774_v2  ;;  %v772_v4 = vmul.f32 1.442695, %v770_v3 }
 0x51a   :  { %1243 = vpow2.f32 %v772_v4 }
 0x525   :  { %v1242_v5 = vpop.eup %1241 }
 0x526   :  { %v1087_v9 = vadd.f32 -1.0, %v1242_v5 }
 0x527   :  { %v1244_v8 = vpop.eup %1243 }
 0x528   :  { %v1086_v10 = vadd.f32 -1.0, %v1244_v8  ;;  %v779_v13 = vsel %vm769_vm5, %v767_v61, %v1087_v9 }
 0x52a   :  { %v778_v11 = vsel %vm768_vm4, %v766_v1, %v1086_v10 }
 0x52b   :  { %1185 = vmatprep.mubr.msk.f32.mxu0 %vm788_vm3, %v778_v11 }
 0x52c   :  { %1186 = vmatmul.mubr.msk.f32.vlgmr.msra.gmra.mxu0 %vm788_vm3, %v779_v13 }
 0x5ec   :  { %v1187_v15 = vpop.f32.mrf.mxu0 }
 0x5ed   :  { %874 = vrot.lane.b32.xlu1 %v1187_v15, %s1275_s3  ;;  %1188 = vmatprep.subr.mxu1 %v1187_v15 }
 0x5ee   :  { %v861_v16 = vpop.f32.mrf.mxu0  ;;  %1189 = vmatpush3.msra.mxu1 %v1187_v15 }
 0x5ef   :  { %872 = vrot.lane.b32.xlu0 %v861_v16, %s1275_s3  ;;  %1190 = vmatprep.subr.mxu1 %v861_v16 }
 0x5f0   :  { %1191 = vmatpush3.msra.mxu1 %v861_v16 }
 0x5f1   :  { %915 = vperm.xlu1 %1208, %v1187_v15  }
 0x5f3   :  { %911 = vperm.xlu0 %1207, %v861_v16  }
 0x65f   :  { %v875_v18 = vpop.permute.xlu1 %874 }
 0x661   :  { %v873_v17 = vpop.permute.xlu0 %872 }
 0x662   :  { %878 = vxpose.xlu1.b32.start [1/2] (short) (narrow) %v873_v17, 8 }
 0x666   :  { %879 = vxpose.xlu1.b32.end [2/2] (short) (narrow) %v875_v18, 8 }
 0x66c   :  { %v916_v19 = vpop.permute.xlu1 %915 }
 0x66e   :  { %v912_v21 = vpop.permute.xlu0 %911 }
 0x6de   :  { %v894_v7 = vpop.trf.xlu1 }
 0x6df   :  { %v921_v20 = vrot.slane %v894_v7, %v1333_v12 }
 0x6e1   :  { %v922_v22 = vadd.f32 %v921_v20, %v912_v21  ;;  %v923_v23 = vadd.f32 %v921_v20, %v916_v19 }
 0x6e3   :  { %v924_v24 = vmul.f32 0.2, %v922_v22  ;;  %v925_v25 = vmul.f32 0.2, %v923_v23 }
 0x6e5   :  { %v926_v26 = vmax.f32 %v922_v22, %v924_v24  ;;  %v927_v27 = vmax.f32 %v923_v23, %v925_v25 }
 0x6e7   :  { %v928_v28 = vadd.f32 %v926_v26, %v1347_v53  ;;  %v929_v30 = vadd.f32 %v927_v27, %v1342_v49 }
 0x6e9   :  { %v930_v29 = vsel %vm306_vm1, %v928_v28, -inf  ;;  %v933_v31 = vsel %vm306_vm1, %v929_v30, -inf }
 0x6ea   :  { %931 = vmax.xlane.f32.xlu0 %v930_v29 }
 0x6ee   :  { %934 = vmax.xlane.f32.xlu0 %v933_v31 }
 0x773   :  { %v932_v32 = vpop.xlane.xlu0 %931 }
 0x774   :  { %v936_v33 = vsub.f32 %v928_v28, %v932_v32 }
 0x776   :  { %v938_v12 = vmul.f32 1.442695, %v936_v33 }
 0x777   :  { %v935_v34 = vpop.xlane.xlu0 %934 }
 0x778   :  { %1245 = vpow2.f32 %v938_v12  ;;  %v937_v35 = vsub.f32 %v929_v30, %v935_v34 }
 0x77a   :  { %v940_v36 = vmul.f32 1.442695, %v937_v35 }
 0x77c   :  { %1247 = vpow2.f32 %v940_v36 }
 0x785   :  { %v1246_v37 = vpop.eup %1245 }
 0x786   :  { %v942_v38 = vsel %vm306_vm1, %v1246_v37, 0.0 }
 0x787   :  { %943 = vadd.xlane.f32.xlu0 %v942_v38 }
 0x789   :  { %v1248_v53 = vpop.eup %1247 }
 0x78a   :  { %v945_v6 = vsel %vm306_vm1, %v1248_v53, 0.0 }
 0x78b   :  { %946 = vadd.xlane.f32.xlu0 %v945_v6 }
 0x810   :  { %v944_v49 = vpop.xlane.xlu0 %943 }
 0x811   :  { %1249 = vrcp.f32 %v944_v49 }
 0x814   :  { %v947_v39 = vpop.xlane.xlu0 %946 }
 0x815   :  { %1251 = vrcp.f32 %v947_v39 }
 0x81e   :  { %v1250_v40 = vpop.eup %1249 }
 0x81f   :  { %v950_v41 = vmul.f32 %v1250_v40, %v1246_v37 }
 0x821   :  { %1192 = vmatprep.mubr.msk.f32.mxu1 %vm306_vm1, %v950_v41 }
 0x822   :  { %v1252_v42 = vpop.eup %1251 }
 0x823   :  { %v951_v43 = vmul.f32 %v1252_v42, %v1248_v53 }
 0x825   :  { %1193 = vmatmul.mubr.msk.f32.vlgmr.msra.gmra.mxu1 %vm306_vm1, %v951_v43 }
 0x8e5   :  { %v1194_v44 = vpop.f32.mrf.mxu1 }
 0x8e6   :  { %v1036_v45 = vmin.f32 %v1194_v44, 0.0  ;;  %vm1034_vm7 = vcmp.gt.f32.partialorder %v1194_v44, 0.0 }
 0x8e7   :  { %v1024_v46 = vpop.f32.mrf.mxu1 }
 0x8e8   :  { %v1039_v47 = vmul.f32 1.442695, %v1036_v45  ;;  %v1035_v48 = vmin.f32 %v1024_v46, 0.0  ;;  %vm1033_vm8 = vcmp.gt.f32.partialorder %v1024_v46, 0.0 }
 0x8ea   :  { %1253 = vpow2.f32 %v1039_v47  ;;  %v1037_v50 = vmul.f32 1.442695, %v1035_v48 }
 0x8ec   :  { %1255 = vpow2.f32 %v1037_v50 }
 0x8f7   :  { %v1254_v51 = vpop.eup %1253 }
 0x8f8   :  { %v1093_v52 = vadd.f32 -1.0, %v1254_v51 }
 0x8f9   :  { %v1256_v54 = vpop.eup %1255 }
 0x8fa   :  { %v1044_v55 = vsel %vm1034_vm7, %v1194_v44, %v1093_v52  ;;  %v1092_v56 = vadd.f32 -1.0, %v1256_v54 }
 0x8fb   :  { %v1049_v57 = vsel %vm1045_vm6, %v1044_v55, -inf }
 0x8fc   :  { %1050 = vmax.xlane.f32.xlu0 %v1049_v57  ;;  %v1043_v58 = vsel %vm1033_vm8, %v1024_v46, %v1092_v56 }
 0x8fd   :  { %v1046_v59 = vsel %vm1045_vm6, %v1043_v58, -inf }
 0x8fe   :  { %1047 = vmax.xlane.f32.xlu1 %v1046_v59 }
 0x985   :  { %v1051_v60 = vpop.xlane.xlu0 %1050 }
 0x986   :  { %v1053_v61 = vsub.f32 %v1044_v55, %v1051_v60 }
 0x987   :  { %v1048_v62 = vpop.xlane.xlu1 %1047 }
 0x988   :  { %v1052_v63 = vsub.f32 %v1043_v58, %v1048_v62  ;;  %v1056_v0 = vmul.f32 1.442695, %v1053_v61 }
 0x98a   :  { %v1054_v1 = vmul.f32 1.442695, %v1052_v63 }
 0x98c   :  { %1257 = vpow2.f32 %v1054_v1 }
 0x98d   :  { %1259 = vpow2.f32 %v1056_v0 }
 0x999   :  { %v1258_v2 = vpop.eup %1257 }
 0x99a   :  { %v1058_v3 = vsel %vm1045_vm6, %v1258_v2, 0.0  ;;  %v1260_v4 = vpop.eup %1259 }
 0x99b   :  { %1059 = vadd.xlane.f32.xlu0 %v1058_v3  ;;  %v1061_v5 = vsel %vm1045_vm6, %v1260_v4, 0.0 }
 0x99f   :  { %1062 = vadd.xlane.f32.xlu0 %v1061_v5 }
 0xa24   :  { %v1060_v8 = vpop.xlane.xlu0 %1059 }
 0xa25   :  { %1261 = vlog2.f32 %v1060_v8 }
 0xa28   :  { %v1063_v9 = vpop.xlane.xlu0 %1062 }
 0xa29   :  { %1263 = vlog2.f32 %v1063_v9 }
 0xa32   :  { %v1262_v10 = vpop.eup %1261 }
 0xa33   :  { %v1065_v11 = vmul.f32 0.6931472, %v1262_v10 }
 0xa35   :  { %v1068_v13 = vsub.f32 %v1052_v63, %v1065_v11 }
 0xa36   :  { %v1264_v14 = vpop.eup %1263 }
 0xa37   :  { %1070 = vst.msk [vmem:[%s1449_s4] sm:$0xff] %vm1045_vm6, %v1068_v13  ;;  %v1067_v15 = vmul.f32 0.6931472, %v1264_v14 }
 0xa39   :  { %v1069_v16 = vsub.f32 %v1053_v61, %v1067_v15 }
 0xa3b   :  { %1071 = vst.msk [vmem:[%s1449_s4 + $0x8] sm:$0xff] %vm1045_vm6, %v1069_v16 }

</bundles_post_ra>
